<compile_context>
chip_gen: v7x
topology: tpu7x:2x2x1
jax: 0.10.0
libtpu: 0.0.40
codegen_flags: <defaults>
</compile_context>

<pallas_src>
import functools

import jax
import jax.numpy as jnp
from jax import lax
from jax.experimental import pallas as pl
from jax.experimental.pallas import tpu as pltpu

BN_EPS = 1e-5


def _round_up(v, m):
    return ((v + m - 1) // m) * m


def _pick_tile(padded, max_tile):
    """Largest multiple-of-128 tile <= max_tile that evenly divides `padded`."""
    best = 128
    t = 128
    while t <= max_tile:
        if padded % t == 0:
            best = t
        t += 128
    return best


def linear_bn_relu_kernel(x_ref, w_ref, gb_ref, o_ref, acc_ref, *, n_real):
    # x_ref:  (n_pad, tk)  bf16     w_ref: (tk, tn) bf16 (already K-major)
    # gb_ref: (2, tn)      f32      o_ref: (n_pad, tn)
    # acc_ref:(n_pad, tn)  f32 scratch, persists across the K grid axis.
    k = pl.program_id(1)

    @pl.when(k == 0)
    def _init():
        acc_ref[...] = jnp.zeros_like(acc_ref)

    # MXU-native (M,K)x(K,N) form, bf16 operands, f32 accumulation.
    acc_ref[...] += jnp.dot(x_ref[...], w_ref[...],
                            preferred_element_type=jnp.float32)

    @pl.when(k == pl.num_programs(1) - 1)
    def _epilogue():
        y = acc_ref[...]                              # (n_pad, tn) f32
        n_pad = y.shape[0]
        inv_n = 1.0 / n_real

        # Padded batch rows of y are exactly zero (zero-padded x, no bias), so the
        # sum over all rows equals the sum over real rows.
        mean = jnp.sum(y, axis=0, keepdims=True) * inv_n

        # Two-pass (centered) variance; mask the padded rows out of the squared sum.
        centered = y - mean
        if n_pad != n_real:
            rows = lax.broadcasted_iota(jnp.int32, y.shape, 0)
            centered = jnp.where(rows < n_real, centered, 0.0)
        var = jnp.sum(centered * centered, axis=0, keepdims=True) * inv_n

        # Fold BN affine into one per-feature scale/shift, then ReLU.
        gamma = gb_ref[0:1, :]
        beta = gb_ref[1:2, :]
        scale = gamma * lax.rsqrt(var + BN_EPS)       # EUP rsqrt
        shift = beta - mean * scale
        o_ref[...] = jnp.maximum(y * scale + shift, 0.0).astype(o_ref.dtype)


def linear_block(x, weight, bias, gamma, beta, *,
                 max_feature_tile=256, max_k_tile=512,
                 matmul_dtype=jnp.bfloat16):
    """LinearBlock forward (use_bn=True, training-mode batch statistics).

    x:      (N, in_dim) f32
    weight: (out_dim, in_dim) f32  (PyTorch nn.Linear layout)
    bias:   (out_dim,)  -- cancels exactly in training-mode BatchNorm (y - mean)
    gamma:  (out_dim,)  BatchNorm1d weight
    beta:   (out_dim,)  BatchNorm1d bias
    """
    del bias  # per-feature constant added before BN cancels exactly in (y - mean)

    n, in_dim = x.shape
    out_dim, in_dim_w = weight.shape
    assert in_dim_w == in_dim

    # ---- padded / tiled geometry -------------------------------------------
    n_pad = _round_up(n, 16)            # dense bf16 LHS vregs + unmasked f32 stores
    k_pad = _round_up(in_dim, 128)
    out_pad = _round_up(out_dim, 128)

    tk = k_pad if k_pad <= max_k_tile else _pick_tile(k_pad, max_k_tile)
    tn = out_pad if out_pad <= max_feature_tile else _pick_tile(out_pad, max_feature_tile)
    # Keep >= 2 feature tiles when possible so ("parallel",) can feed both v7x TensorCores.
    if out_pad // tn < 2 and tn >= 256 and (tn // 2) % 128 == 0:
        tn //= 2
    num_j = out_pad // tn
    num_k = k_pad // tk

    # ---- operand prep (one-time layout/dtype plumbing outside the kernel) ---
    x_p = x
    if (n_pad, k_pad) != (n, in_dim):
        x_p = jnp.pad(x, ((0, n_pad - n), (0, k_pad - in_dim)))
    x_mm = x_p.astype(matmul_dtype)

    # Pre-transpose once: MXU consumes (K, N) natively -> no per-tile XLU transpose.
    w_t = weight.T
    if (k_pad, out_pad) != (in_dim, out_dim):
        w_t = jnp.pad(w_t, ((0, k_pad - in_dim), (0, out_pad - out_dim)))
    w_mm = w_t.astype(matmul_dtype)

    # gamma/beta fused into a single (2, out_pad) f32 operand.
    gb = jnp.stack([
        jnp.pad(gamma.astype(jnp.float32), (0, out_pad - out_dim)),
        jnp.pad(beta.astype(jnp.float32), (0, out_pad - out_dim)),
    ])

    # ---- block specs ---------------------------------------------------------
    # x is grid-invariant when there is a single K step: single-buffer it (VMEM saver).
    x_single_buffered = (num_k == 1 and num_j > 1)
    if x_single_buffered:
        x_spec = pl.BlockSpec((n_pad, tk), lambda j, k: (0, k),
                              pipeline_mode=pl.Buffered(1))
        x_bufs = 1
    else:
        x_spec = pl.BlockSpec((n_pad, tk), lambda j, k: (0, k))
        x_bufs = 2

    # The weight is the streamed, bandwidth-dominant operand: buffer it deeper
    # when the grid is long enough for the extra buffer to hide DMA latency.
    if num_j * num_k >= 4:
        w_spec = pl.BlockSpec((tk, tn), lambda j, k: (k, j),
                              pipeline_mode=pl.Buffered(3))
        w_bufs = 3
    else:
        w_spec = pl.BlockSpec((tk, tn), lambda j, k: (k, j))
        w_bufs = 2

    gb_spec = pl.BlockSpec((2, tn), lambda j, k: (0, j))      # re-fetched only when j changes
    out_spec = pl.BlockSpec((n_pad, tn), lambda j, k: (0, j))  # resident across the K axis

    # ---- VMEM budget & cost estimate ----------------------------------------
    budget = (x_bufs * n_pad * tk * 2
              + w_bufs * tk * tn * 2
              + 2 * 2 * tn * 4
              + 2 * n_pad * tn * 4
              + n_pad * tn * 4)
    # 2x headroom for compiler temporaries in the f32 epilogue; cap at the smallest
    # physical VMEM (v7x: 64 MiB per TensorCore).
    vmem_limit = int(min(64 * 2 ** 20, max(32 * 2 ** 20, 2 * budget)))

    cost = pl.CostEstimate(
        flops=2 * n_pad * k_pad * out_pad,
        transcendentals=out_pad,  # one rsqrt per output feature
        bytes_accessed=(n_pad * k_pad * 2 * num_j      # x re-streamed per feature tile
                        + k_pad * out_pad * 2          # weight streamed once
                        + 2 * out_pad * 4              # gamma/beta
                        + n_pad * out_pad * 4),        # output
    )

    kernel = functools.partial(linear_bn_relu_kernel, n_real=n)

    out = pl.pallas_call(
        kernel,
        out_shape=jax.ShapeDtypeStruct((n_pad, out_pad), x.dtype),
        grid_spec=pltpu.PrefetchScalarGridSpec(
            num_scalar_prefetch=0,
            grid=(num_j, num_k),           # feature tiles (parallel), K reduction last (arbitrary)
            in_specs=[x_spec, w_spec, gb_spec],
            out_specs=out_spec,
            scratch_shapes=[pltpu.VMEM((n_pad, tn), jnp.float32)],
        ),
        compiler_params=pltpu.CompilerParams(
            dimension_semantics=("parallel", "arbitrary"),
            vmem_limit_bytes=vmem_limit,
        ),
        cost_estimate=cost,
    )(x_mm, w_mm, gb)

    return out[:n, :out_dim]


if __name__ == "__main__":
    def torch_reference(x, weight, bias, gamma, beta, *, matmul_dtype=None):
        if matmul_dtype is not None:
            y = jnp.dot(x.astype(matmul_dtype), weight.astype(matmul_dtype).T,
                        preferred_element_type=jnp.float32) + bias
        else:
            y = x @ weight.T + bias
        mu = y.mean(axis=0, keepdims=True)
        var = ((y - mu) ** 2).mean(axis=0, keepdims=True)
        return jnp.maximum(gamma * (y - mu) * lax.rsqrt(var + BN_EPS) + beta, 0.0)

    key = jax.random.PRNGKey(0)

    cases = [
        (8, 32, 64),      # module-scale: single feature tile, single K step, batch-pad mask
        (24, 640, 320),   # multi feature-tile + K-tiled accumulator + deeper weight buffering
    ]
    for (N, IN_DIM, OUT_DIM) in cases:
        key, kx, kw, kb, kg, kbt = jax.random.split(key, 6)
        x = jax.random.normal(kx, (N, IN_DIM), dtype=jnp.float32)

        # nn.Linear default init: uniform(-1/sqrt(in_dim), 1/sqrt(in_dim)).
        bound = 1.0 / (IN_DIM ** 0.5)
        weight = jax.random.uniform(kw, (OUT_DIM, IN_DIM), jnp.float32, -bound, bound)
        bias = jax.random.uniform(kb, (OUT_DIM,), jnp.float32, -bound, bound)
        # Non-trivial BN affine to exercise the folded scale/shift.
        gamma = jax.random.uniform(kg, (OUT_DIM,), jnp.float32, 0.5, 1.5)
        beta = 0.1 * jax.random.normal(kbt, (OUT_DIM,), dtype=jnp.float32)

        out = jax.block_until_ready(linear_block(x, weight, bias, gamma, beta))
        assert out.shape == (N, OUT_DIM)
        assert bool(jnp.all(jnp.isfinite(out)))
        assert bool(jnp.all(out >= 0.0))

        # Reference matching the kernel's bf16-matmul / f32-epilogue numerics
        # (includes the Linear bias: it cancels in training-mode BN).
        ref_bf16 = torch_reference(x, weight, bias, gamma, beta, matmul_dtype=jnp.bfloat16)
        assert jnp.allclose(out, ref_bf16, atol=5e-3, rtol=5e-3), \
            f"bf16-reference mismatch for shapes {(N, IN_DIM, OUT_DIM)}"

        # Full-f32 PyTorch-semantics reference (looser tolerance for bf16 MXU operands).
        ref_f32 = torch_reference(x, weight, bias, gamma, beta)
        assert jnp.allclose(out, ref_f32, atol=7e-2, rtol=7e-2), \
            f"f32-reference mismatch for shapes {(N, IN_DIM, OUT_DIM)}"

    print("KERNEL_OK")
</pallas_src>

<mosaic_0001>
module attributes {stable_mosaic.version = 11 : i64} {
  func.func @linear_bn_relu_kernel(%arg0: i32, %arg1: i32, %arg2: memref<16x128xbf16, #tpu.memory_space<vmem>>, %arg3: memref<128x128xbf16, #tpu.memory_space<vmem>>, %arg4: memref<2x128xf32, #tpu.memory_space<vmem>>, %arg5: memref<16x128xf32, #tpu.memory_space<vmem>>, %arg6: memref<16x128xf32, #tpu.memory_space<vmem>>) attributes {dimension_semantics = [#tpu.dimension_semantics<parallel>, #tpu.dimension_semantics<arbitrary>], iteration_bounds = array<i64: 1, 1>, scalar_prefetch = 0 : i64, scratch_operands = 1 : i64, tpu.core_type = #tpu.core_type<tc>, window_params = [{transform_indices = @transform_0, window_bounds = array<i64: 16, 128>}, {transform_indices = @transform_1, window_bounds = array<i64: 128, 128>}, {transform_indices = @transform_2, window_bounds = array<i64: 2, 128>}, {transform_indices = @transform_3, window_bounds = array<i64: 16, 128>}]} {
    %c0_i32 = arith.constant 0 : i32
    %0 = arith.cmpi eq, %arg1, %c0_i32 : i32
    %1 = arith.extui %0 : i1 to i32
    %c0_i32_0 = arith.constant 0 : i32
    %2 = arith.cmpi ne, %1, %c0_i32_0 : i32
    scf.if %2 {
      %cst_10 = arith.constant 0.000000e+00 : f32
      %12 = vector.broadcast %cst_10 : f32 to vector<16x128xf32>
      %c0_11 = arith.constant 0 : index
      %c0_12 = arith.constant 0 : index
      %13 = vector.load %arg6[%c0_11, %c0_12] : memref<16x128xf32, #tpu.memory_space<vmem>>, vector<16x128xf32>
      tpu.vector_store %arg6[%c0_11, %c0_12], %12 {strides = array<i32>} : memref<16x128xf32, #tpu.memory_space<vmem>>, vector<16x128xf32>,
    } else {
    }
    %c0 = arith.constant 0 : index
    %c0_1 = arith.constant 0 : index
    %3 = vector.load %arg6[%c0, %c0_1] : memref<16x128xf32, #tpu.memory_space<vmem>>, vector<16x128xf32>
    %c0_2 = arith.constant 0 : index
    %c0_3 = arith.constant 0 : index
    %4 = vector.load %arg2[%c0_2, %c0_3] : memref<16x128xbf16, #tpu.memory_space<vmem>>, vector<16x128xbf16>
    %c0_4 = arith.constant 0 : index
    %c0_5 = arith.constant 0 : index
    %5 = vector.load %arg3[%c0_4, %c0_5] : memref<128x128xbf16, #tpu.memory_space<vmem>>, vector<128x128xbf16>
    %cst = arith.constant dense<0.000000e+00> : vector<16x128xf32>
    %6 = tpu.matmul %4, %5, %cst {dimension_numbers = #tpu.dot_dimension_numbers<[1], [0], [0], [1], [0, 0, 1, 1], [], []>} : vector<16x128xbf16>, vector<128x128xbf16>, vector<16x128xf32> -> vector<16x128xf32>
    %7 = arith.addf %3, %6 : vector<16x128xf32>
    %c0_6 = arith.constant 0 : index
    %c0_7 = arith.constant 0 : index
    %8 = vector.load %arg6[%c0_6, %c0_7] : memref<16x128xf32, #tpu.memory_space<vmem>>, vector<16x128xf32>
    tpu.vector_store %arg6[%c0_6, %c0_7], %7 {strides = array<i32>} : memref<16x128xf32, #tpu.memory_space<vmem>>, vector<16x128xf32>,
    %c0_i32_8 = arith.constant 0 : i32
    %9 = arith.cmpi eq, %arg1, %c0_i32_8 : i32
    %10 = arith.extui %9 : i1 to i32
    %c0_i32_9 = arith.constant 0 : i32
    %11 = arith.cmpi ne, %10, %c0_i32_9 : i32
    scf.if %11 {
      %c0_10 = arith.constant 0 : index
      %c0_11 = arith.constant 0 : index
      %12 = vector.load %arg6[%c0_10, %c0_11] : memref<16x128xf32, #tpu.memory_space<vmem>>, vector<16x128xf32>
      %cst_12 = arith.constant dense<0.000000e+00> : vector<128xf32>
      %13 = vector.multi_reduction <add>, %12, %cst_12 [0] : vector<16x128xf32> to vector<128xf32>
      %14 = vector.shape_cast %13 : vector<128xf32> to vector<1x128xf32>
      %cst_13 = arith.constant 1.250000e-01 : f32
      %15 = vector.broadcast %cst_13 : f32 to vector<1x128xf32>
      %16 = arith.mulf %14, %15 : vector<1x128xf32>
      %17 = vector.broadcast %16 : vector<1x128xf32> to vector<16x128xf32>
      %18 = arith.subf %12, %17 : vector<16x128xf32>
      %19 = tpu.iota {dimensions = array<i32: 0>} : vector<16x128xi32>
      %c8_i32 = arith.constant 8 : i32
      %20 = vector.broadcast %c8_i32 : i32 to vector<16x128xi32>
      %21 = arith.cmpi slt, %19, %20 : vector<16x128xi32>
      %cst_14 = arith.constant 0.000000e+00 : f32
      %22 = vector.broadcast %cst_14 : f32 to vector<16x128xf32>
      %23 = arith.select %21, %18, %22 : vector<16x128xi1>, vector<16x128xf32>
      %24 = arith.mulf %23, %23 : vector<16x128xf32>
      %cst_15 = arith.constant dense<0.000000e+00> : vector<128xf32>
      %25 = vector.multi_reduction <add>, %24, %cst_15 [0] : vector<16x128xf32> to vector<128xf32>
      %26 = vector.shape_cast %25 : vector<128xf32> to vector<1x128xf32>
      %cst_16 = arith.constant 1.250000e-01 : f32
      %27 = vector.broadcast %cst_16 : f32 to vector<1x128xf32>
      %28 = arith.mulf %26, %27 : vector<1x128xf32>
      %c0_17 = arith.constant 0 : index
      %c0_18 = arith.constant 0 : index
      %29 = vector.load %arg4[%c0_17, %c0_18] : memref<2x128xf32, #tpu.memory_space<vmem>>, vector<1x128xf32>
      %c1 = arith.constant 1 : index
      %c0_19 = arith.constant 0 : index
      %30 = vector.load %arg4[%c1, %c0_19] : memref<2x128xf32, #tpu.memory_space<vmem>>, vector<1x128xf32>
      %cst_20 = arith.constant 9.99999974E-6 : f32
      %31 = vector.broadcast %cst_20 : f32 to vector<1x128xf32>
      %32 = arith.addf %28, %31 : vector<1x128xf32>
      %33 = math.rsqrt %32 : vector<1x128xf32>
      %34 = arith.mulf %29, %33 : vector<1x128xf32>
      %35 = arith.mulf %16, %34 : vector<1x128xf32>
      %36 = arith.subf %30, %35 : vector<1x128xf32>
      %37 = vector.broadcast %34 : vector<1x128xf32> to vector<16x128xf32>
      %38 = arith.mulf %12, %37 : vector<16x128xf32>
      %39 = vector.broadcast %36 : vector<1x128xf32> to vector<16x128xf32>
      %40 = arith.addf %38, %39 : vector<16x128xf32>
      %cst_21 = arith.constant 0.000000e+00 : f32
      %41 = vector.broadcast %cst_21 : f32 to vector<16x128xf32>
      %42 = arith.maximumf %40, %41 : vector<16x128xf32>
      %c0_22 = arith.constant 0 : index
      %c0_23 = arith.constant 0 : index
      %43 = vector.load %arg5[%c0_22, %c0_23] : memref<16x128xf32, #tpu.memory_space<vmem>>, vector<16x128xf32>
      tpu.vector_store %arg5[%c0_22, %c0_23], %42 {strides = array<i32>} : memref<16x128xf32, #tpu.memory_space<vmem>>, vector<16x128xf32>,
    } else {
    }
    return
  }
  func.func @transform_0(%arg0: i32, %arg1: i32) -> (i32, i32) {
    %c0_i32 = arith.constant 0 : i32
    %c0_i32_0 = arith.constant 0 : i32
    return %c0_i32, %arg1 : i32, i32
  }
  func.func @transform_1(%arg0: i32, %arg1: i32) -> (i32, i32) {
    %c0_i32 = arith.constant 0 : i32
    return %arg1, %arg0 : i32, i32
  }
  func.func @transform_2(%arg0: i32, %arg1: i32) -> (i32, i32) {
    %c0_i32 = arith.constant 0 : i32
    %c0_i32_0 = arith.constant 0 : i32
    return %c0_i32, %arg0 : i32, i32
  }
  func.func @transform_3(%arg0: i32, %arg1: i32) -> (i32, i32) {
    %c0_i32 = arith.constant 0 : i32
    %c0_i32_0 = arith.constant 0 : i32
    return %c0_i32, %arg0 : i32, i32
  }
}

</mosaic_0001>

<bundles_post_ra>
// kernel: tpu_custom_call.1
= control target key start
LH: loop header
LB: loop body
LE: loop exit
PB: predicated region body
PF: predicated region fallthrough
CT: control target
= control target key end

     0   :  { %8 = vsyncpa [#allocation4], 0  ;;  %s443_s0 = inlined_call_operand.hbm [shape: bf16[16,128], index: 0, kind: input, shape index: {}]   ;;  %s444_s1 = inlined_call_operand.hbm [shape: bf16[128,128], index: 1, kind: input, shape index: {}]   ;;  %s445_s2 = inlined_call_operand.vmem [shape: f32[2,128], index: 2, kind: input, shape index: {}]   ;;  %s446_s3 = inlined_call_operand.hbm [shape: f32[16,128], index: 3, kind: output, shape index: {}]  }
   0x1   :  { %9 = vsyncpa [#allocation7], 0 }
   0x2   :  { %10 = vsyncpa [#allocation5], 0  ;;  %s372_s12 = smov [#allocation3]   ;;  %s300_s16 = scalar_lea.hbm %s443_s0, 128 }
   0x3   :  { %s16_s13 = sshll.u32 %s372_s12, 4  ;;  %p301_p0 = scmp.ne.s32.totalorder %s443_s0, %s300_s16  ;;  %s17_s13 = int_to_ptr.vmem [resolvable:$true] %s16_s13 }
   0x4   :  { %p304_p1 = scmp.lt.u32.totalorder %s300_s16, %s443_s0 }
   0x6   :  { %p306_p2 = pnand %p304_p1, %p301_p0 }
   0x8   :  { %309 = shalt.err (!%p306_p2)
}
   0x9   :  { %s310_s21 = scalar_lea.vmem %s17_s13, 128  ;;  %p315_p4 = scmp.lt.s32.totalorder %s17_s13, %s17_s13 }
   0xa   :  { %p311_p3 = scmp.ne.s32.totalorder %s17_s13, %s310_s21  ;;  %p316_p5 = scmp.lt.s32.totalorder %s310_s21, %s310_s21 }
   0xc   :  { %p317_p6 = por %p316_p5, %p315_p4 }
   0xe   :  { %p318_p7 = pnand %p317_p6, %p311_p3 }
  0x10   :  { %321 = shalt.err (!%p318_p7)
}
  0x11   :  { %s373_s22 = smov 64   ;;  %s374_s23 = smov 4  }
  0x12   :  { %22 = dma.hbm_to_vmem [thread:$0]  %s443_s0, 128, %s17_s13, [#allocation4], %s373_s22, %s373_s22, %s374_s23  }
  0x13   :  { %s375_s26 = smov [#allocation6]   ;;  %s322_s30 = scalar_lea.hbm %s444_s1, 1024 }
  0x14   :  { %s28_s27 = sshll.u32 %s375_s26, 4  ;;  %p323_p8 = scmp.ne.s32.totalorder %s444_s1, %s322_s30  ;;  %s29_s27 = int_to_ptr.vmem [resolvable:$true] %s28_s27 }
  0x15   :  { %p326_p9 = scmp.lt.u32.totalorder %s322_s30, %s444_s1 }
  0x17   :  { %p328_p10 = pnand %p326_p9, %p323_p8 }
  0x19   :  { %331 = shalt.err (!%p328_p10)
}
  0x1a   :  { %s332_s8 = scalar_lea.vmem %s29_s27, 1024  ;;  %p337_p12 = scmp.lt.s32.totalorder %s29_s27, %s29_s27 }
  0x1b   :  { %p333_p11 = scmp.ne.s32.totalorder %s29_s27, %s332_s8  ;;  %p338_p13 = scmp.lt.s32.totalorder %s332_s8, %s332_s8 }
  0x1d   :  { %p339_p0 = por %p338_p13, %p337_p12 }
  0x1f   :  { %p340_p1 = pnand %p339_p0, %p333_p11 }
  0x21   :  { %343 = shalt.err (!%p340_p1)
}
  0x22   :  { %34 = dma.hbm_to_vmem [thread:$0]  %s444_s1, 1024, %s29_s27, [#allocation7], %s373_s22, %s373_s22, %s374_s23  }
  0x23   :  { %366 = dma.done.wait [#allocation4], 128  }
  0x24   :  { %367 = vsyncadd [#allocation4], 4294967168 }
  0x25   :  { %368 = dma.done.wait [#allocation7], 1024  }
  0x26   :  { %369 = vsyncadd [#allocation7], 4294966272  ;;  %v376_v0 = vmov 0.0   ;;  %vm377_vm0 = vmmov 0   ;;  %v289_v1 = vld [vmem:[#allocation6] sm:$0xff]   ;;  %v290_v2 = vld [vmem:[#allocation6 + $0x8] sm:$0xff]   ;;  %v208_v32 = vlaneseq }
  0x27   :  { %260 = vmatprep.subr.bf16.mxu0 %v376_v0  ;;  %276 = vmatprep.mubr.msk.bf16.mxu0 %vm377_vm0, %v376_v0  ;;  %v291_v3 = vld [vmem:[#allocation6 + $0x10] sm:$0xff]   ;;  %v292_v4 = vld [vmem:[#allocation6 + $0x18] sm:$0xff]   ;;  %v293_v5 = vld [vmem:[#allocation6 + $0x20] sm:$0xff]   ;;  %s378_s13 = smov [#allocation8]  }
  0x28   :  { %261 = vmatpush3.bf16.msra.mxu0 %v289_v1  ;;  %v294_v6 = vld [vmem:[#allocation6 + $0x28] sm:$0xff]   ;;  %v295_v7 = vld [vmem:[#allocation6 + $0x30] sm:$0xff]   ;;  %v296_v8 = vld [vmem:[#allocation6 + $0x38] sm:$0xff]   ;;  %v209_v33 = vshrl.u32 %v208_v32, 7  ;;  %s229_s14 = sshll.u32 %s378_s13, 4  ;;  %s230_s14 = int_to_ptr.vmem [resolvable:$true] %s229_s14 }
  0x29   :  { %262 = vmatprep.subr.bf16.mxu0 %v376_v0  ;;  %v297_v9 = vld [vmem:[#allocation3] sm:$0xff]   ;;  %s344_s15 = scalar_lea.vmem %s230_s14, 256  ;;  %p349_p3 = scmp.lt.s32.totalorder %s230_s14, %s230_s14 }
  0x2a   :  { %v201_v34 = vld [vmem:[%s445_s2] sm:$0x1]  ;;  %v210_v35 = vsub.s32 0, %v209_v33  ;;  %v202_v38 = vld [vmem:[%s445_s2 + $0x1] sm:$0x1]  ;;  %p345_p2 = scmp.ne.s32.totalorder %s230_s14, %s344_s15  ;;  %p350_p4 = scmp.lt.s32.totalorder %s344_s15, %s344_s15 }
  0x2c   :  { %263 = vmatpush3.bf16.msra.mxu0 %v290_v2  ;;  %p351_p5 = por %p350_p4, %p349_p3 }
  0x2d   :  { %264 = vmatprep.subr.bf16.mxu0 %v376_v0 }
  0x2e   :  { %p352_p6 = pnand %p351_p5, %p345_p2 }
  0x30   :  { %265 = vmatpush3.bf16.msra.mxu0 %v291_v3 }
  0x31   :  { %266 = vmatprep.subr.bf16.mxu0 %v376_v0 }
  0x34   :  { %267 = vmatpush3.bf16.msra.mxu0 %v292_v4 }
  0x35   :  { %268 = vmatprep.subr.bf16.mxu0 %v376_v0 }
  0x38   :  { %269 = vmatpush3.bf16.msra.mxu0 %v293_v5 }
  0x39   :  { %270 = vmatprep.subr.bf16.mxu0 %v376_v0 }
  0x3c   :  { %271 = vmatpush3.bf16.msra.mxu0 %v294_v6 }
  0x3d   :  { %272 = vmatprep.subr.bf16.mxu0 %v376_v0 }
  0x40   :  { %273 = vmatpush3.bf16.msra.mxu0 %v295_v7 }
  0x41   :  { %274 = vmatprep.subr.bf16.mxu0 %v376_v0 }
  0x44   :  { %275 = vmatpush3.bf16.msra.mxu0 %v296_v8 }
  0x47   :  { %277 = vmatmul.mubr.bf16.vlgmr.msra.gmra.mrb[0].mxu0 %v297_v9 }
 0x11a   :  { %v158_v10 = vpop.f32.mrb[0].mxu0 }
 0x11b   :  { %v278_v11 = vpop.f32.mrb[1].mxu0 }
 0x11c   :  { %v161_v12 = vpop.f32.mrb[2].mxu0 }
 0x11d   :  { %v174_v13 = vadd.f32 %v161_v12, %v158_v10  ;;  %v279_v14 = vpop.f32.mrb[3].mxu0 }
 0x11f   :  { %v175_v15 = vrot.slane %v174_v13, 4 }
 0x121   :  { %v176_v16 = vadd.f32 %v175_v15, %v174_v13 }
 0x123   :  { %v177_v17 = vrot.slane %v176_v16, 2 }
 0x125   :  { %v178_v18 = vadd.f32 %v177_v17, %v176_v16 }
 0x127   :  { %v179_v19 = vrot.slane %v178_v18, 1 }
 0x129   :  { %v180_v20 = vadd.f32 %v179_v19, %v178_v18 }
 0x12b   :  { %v181_v21 = vmul.f32 0.125, %v180_v20 }
 0x12d   :  { %v182_v22 = vsub.f32 %v158_v10, %v181_v21 }
 0x12f   :  { %v191_v23 = vmul.f32 %v182_v22, %v182_v22 }
 0x131   :  { %v194_v24 = vrot.slane %v191_v23, 4 }
 0x133   :  { %v195_v25 = vadd.f32 %v194_v24, %v191_v23 }
 0x135   :  { %v196_v26 = vrot.slane %v195_v25, 2 }
 0x137   :  { %v197_v27 = vadd.f32 %v196_v26, %v195_v25 }
 0x139   :  { %v198_v28 = vrot.slane %v197_v27, 1 }
 0x13b   :  { %v199_v29 = vadd.f32 %v198_v28, %v197_v27 }
 0x13d   :  { %v200_v30 = vmul.f32 0.125, %v199_v29 }
 0x13f   :  { %v203_v31 = vadd.f32 1e-05, %v200_v30 }
 0x141   :  { %298 = vrsqrt.f32 %v203_v31 }
 0x14b   :  { %v299_v36 = vpop.eup %298 }
 0x14c   :  { %v205_v37 = vmul.f32 %v299_v36, %v201_v34 }
 0x14e   :  { %v206_v39 = vmul.f32 %v205_v37, %v181_v21  ;;  %v211_v40 = vrot.slane %v205_v37, %v210_v35 }
 0x150   :  { %v207_v41 = vsub.f32 %v202_v38, %v206_v39  ;;  %v212_v42 = vmul.f32 %v211_v40, %v158_v10  ;;  %v213_v43 = vmul.f32 %v211_v40, %v161_v12 }
 0x152   :  { %v217_v44 = vrot.slane %v207_v41, %v210_v35 }
 0x154   :  { %v218_v45 = vadd.f32 %v217_v44, %v212_v42  ;;  %v219_v46 = vadd.f32 %v217_v44, %v213_v43 }
 0x156   :  { %v220_v47 = vmax.f32 %v218_v45, 0.0  ;;  %v221_v48 = vmax.f32 %v219_v46, 0.0 }
 0x158   :  { %223 = vst [vmem:[#allocation8 + $0x8] sm:$0xff] %v221_v48  ;;  %222 = vst [vmem:[#allocation8] sm:$0xff] %v220_v47 }
 0x159   :  { %355 = shalt.err (!%p352_p6)
}
 0x15a   :  { %s356_s17 = scalar_lea.hbm %s446_s3, 256 }
 0x15b   :  { %p357_p7 = scmp.ne.s32.totalorder %s446_s3, %s356_s17  ;;  %p360_p8 = scmp.lt.u32.totalorder %s356_s17, %s446_s3 }
 0x15d   :  { %p362_p9 = pnand %p360_p8, %p357_p7 }
 0x15f   :  { %365 = shalt.err (!%p362_p9)
}
 0x160   :  { %s379_s22 = smov 128   ;;  %s380_s23 = smov 8  }
 0x161   :  { %235 = dma.vmem_to_hbm [thread:$0]  %s230_s14, 256, %s446_s3, [#allocation5], %s379_s22, %s379_s22, %s380_s23  }
 0x162   :  { %370 = dma.done.wait [#allocation5], 256  }
 0x163   :  { %371 = vsyncadd [#allocation5], 4294967040 }
 0x164   :  { %239 = vsyncpa [#allocation4], 1 }
 0x165   :  { %240 = vsyncpa [#allocation7], 1 }
 0x166   :  { %241 = vsyncpa [#allocation5], 1 }

</bundles_post_ra>
